<compile_context>
chip_gen: v5e
topology: v5e:2x2
jax: 0.10.0
libtpu: 0.0.40
codegen_flags: <defaults>
</compile_context>

<pallas_src>
import functools
import numpy as np
import jax
import jax.numpy as jnp
from jax.experimental import pallas as pl
from jax.experimental.pallas import tpu as pltpu


def _dense_layer_b_kernel(x_ref, s1_ref, b1_ref, w1_ref, b2_ref, w2_ref, m_ref,
                          o_ref, *, H, W):
    HW = H * W

    # ---- stage 1: BN1 -> ReLU -> 1x1 conv (BN2 scale pre-folded into w1) -> +bias -> ReLU ----
    x = x_ref[0]                                             # (Cin, HW)
    h = jnp.maximum(x * s1_ref[...] + b1_ref[...], 0.0)      # fused BN1 + ReLU
    z = jnp.dot(w1_ref[...], h, preferred_element_type=jnp.float32)
    z = jnp.maximum(z + b2_ref[...], 0.0)                    # (Cmid, HW), f32

    # ---- stage 2: 3x3 conv, padding=1, as 9 shifted matmuls (shift = XLU roll + border mask) ----
    cout = o_ref.shape[1]
    acc = jnp.zeros((cout, HW), jnp.float32)
    k = 0
    for dy in (-1, 0, 1):
        for dx in (-1, 0, 1):
            d = dy * W + dx                                  # flattened spatial offset (static)
            shift = (-d) % HW                                # rolled[p] == z[p + d]
            if shift:
                zs = pltpu.roll(z, shift, 1) * m_ref[k]      # mask emulates zero padding
            else:
                zs = z                                       # center tap: no shift, no border
            acc = acc + jnp.dot(w2_ref[k], zs, preferred_element_type=jnp.float32)
            k += 1

    o_ref[0] = acc.astype(o_ref.dtype)


def dense_layer_b_forward(x, params, *, eps=1e-5):
    """x: (N, Cin, H, W) NCHW (or tuple of tensors to channel-concat); params: see __main__."""
    if isinstance(x, (list, tuple)):
        x = x[0] if len(x) == 1 else jnp.concatenate(x, axis=1)
    (g1, be1, mu1, var1, w1, g2, be2, mu2, var2, w2) = params

    N, Cin, H, W = x.shape
    Cmid = w1.shape[0]
    Cout = w2.shape[0]
    HW = H * W
    f32 = jnp.float32

    # Fold BN1 / BN2 (eval mode) into per-channel scale + bias.
    s1 = (g1 / jnp.sqrt(var1 + eps)).astype(f32)
    b1 = (be1 - mu1 * s1).astype(f32)
    s2 = (g2 / jnp.sqrt(var2 + eps)).astype(f32)
    b2 = (be2 - mu2 * s2).astype(f32)

    # Fold the BN2 scale into the 1x1 conv weight (tiny wrapper-side work).
    w1f = w1.reshape(Cmid, Cin).astype(f32) * s2[:, None]                   # (Cmid, Cin)
    # 3x3 weight as 9 per-tap (Cout, Cmid) matrices, tap-major (ky, kx).
    w2f = jnp.transpose(w2.astype(f32), (2, 3, 0, 1)).reshape(9, Cout, Cmid)

    s1 = s1.reshape(Cin, 1)
    b1 = b1.reshape(Cin, 1)
    b2 = b2.reshape(Cmid, 1)

    # Border masks for the 9 taps (emulate padding=1); built host-side, 9*HW floats.
    masks = np.zeros((9, 1, HW), np.float32)
    hh, ww = np.meshgrid(np.arange(H), np.arange(W), indexing="ij")
    k = 0
    for dy in (-1, 0, 1):
        for dx in (-1, 0, 1):
            valid = ((hh + dy >= 0) & (hh + dy < H) & (ww + dx >= 0) & (ww + dx < W))
            masks[k, 0, :] = valid.reshape(-1).astype(np.float32)
            k += 1
    masks = jnp.asarray(masks)

    x2 = x.reshape(N, Cin, HW)  # free reshape; NCHW layout preserved (no HBM transpose)

    kernel = functools.partial(_dense_layer_b_kernel, H=H, W=W)
    out = pl.pallas_call(
        kernel,
        out_shape=jax.ShapeDtypeStruct((N, Cout, HW), x.dtype),
        grid=(N,),
        in_specs=[
            pl.BlockSpec((1, Cin, HW), lambda i: (i, 0, 0)),      # x (one image per step)
            pl.BlockSpec((Cin, 1), lambda i: (0, 0)),             # BN1 scale
            pl.BlockSpec((Cin, 1), lambda i: (0, 0)),             # BN1 bias
            pl.BlockSpec((Cmid, Cin), lambda i: (0, 0)),          # 1x1 conv weight (BN2-folded)
            pl.BlockSpec((Cmid, 1), lambda i: (0, 0)),            # BN2 bias
            pl.BlockSpec((9, Cout, Cmid), lambda i: (0, 0, 0)),   # 3x3 conv weights (9 taps)
            pl.BlockSpec((9, 1, HW), lambda i: (0, 0, 0)),        # border masks
        ],
        out_specs=pl.BlockSpec((1, Cout, HW), lambda i: (i, 0, 0)),
        compiler_params=pltpu.CompilerParams(
            dimension_semantics=("parallel",)),
    )(x2, s1, b1, w1f, b2, w2f, masks)

    return out.reshape(N, Cout, H, W)


def _reference_forward(x, params, *, eps=1e-5):
    (g1, be1, mu1, var1, w1, g2, be2, mu2, var2, w2) = params

    def bn(t, g, b, mu, var):
        s = g / jnp.sqrt(var + eps)
        return t * s[None, :, None, None] + (b - mu * s)[None, :, None, None]

    h = jax.nn.relu(bn(x, g1, be1, mu1, var1))
    y = jax.lax.conv_general_dilated(h, w1, (1, 1), "VALID",
                                     dimension_numbers=("NCHW", "OIHW", "NCHW"))
    z = jax.nn.relu(bn(y, g2, be2, mu2, var2))
    out = jax.lax.conv_general_dilated(z, w2, (1, 1), ((1, 1), (1, 1)),
                                       dimension_numbers=("NCHW", "OIHW", "NCHW"))
    return out


if __name__ == "__main__":
    key = jax.random.PRNGKey(0)
    N, Cin, H, W = 2, 4, 16, 16              # num_feature_map = 4
    growthrate, bn_size = 8, 4
    Cmid = growthrate * bn_size              # 32
    Cout = growthrate                        # 8

    ks = jax.random.split(key, 12)
    x = jax.random.normal(ks[0], (N, Cin, H, W), dtype=jnp.float32)

    # BatchNorm1 (eval-mode) params, kept O(1) for tame numerics
    g1 = 1.0 + 0.1 * jax.random.normal(ks[1], (Cin,), jnp.float32)
    be1 = 0.1 * jax.random.normal(ks[2], (Cin,), jnp.float32)
    mu1 = 0.1 * jax.random.normal(ks[3], (Cin,), jnp.float32)
    var1 = 1.0 + 0.1 * jax.random.uniform(ks[4], (Cin,), jnp.float32)
    # 1x1 conv weight (Cmid, Cin, 1, 1), no bias
    w1 = jax.random.normal(ks[5], (Cmid, Cin, 1, 1), jnp.float32) * (1.0 / Cin) ** 0.5
    # BatchNorm2 (eval-mode) params
    g2 = 1.0 + 0.1 * jax.random.normal(ks[6], (Cmid,), jnp.float32)
    be2 = 0.1 * jax.random.normal(ks[7], (Cmid,), jnp.float32)
    mu2 = 0.1 * jax.random.normal(ks[8], (Cmid,), jnp.float32)
    var2 = 1.0 + 0.1 * jax.random.uniform(ks[9], (Cmid,), jnp.float32)
    # 3x3 conv weight (Cout, Cmid, 3, 3), padding=1, no bias
    w2 = jax.random.normal(ks[10], (Cout, Cmid, 3, 3), jnp.float32) * (1.0 / (9 * Cmid)) ** 0.5

    params = (g1, be1, mu1, var1, w1, g2, be2, mu2, var2, w2)

    out = jax.block_until_ready(dense_layer_b_forward(x, params))
    ref = jax.block_until_ready(_reference_forward(x, params))

    assert out.shape == (N, Cout, H, W), out.shape
    max_err = float(jnp.max(jnp.abs(out - ref)))
    assert jnp.allclose(out, ref, atol=2e-3, rtol=2e-3), f"mismatch vs reference: {max_err}"

    print("KERNEL_OK")
</pallas_src>

<mosaic_0001>
module attributes {stable_mosaic.version = 11 : i64} {
  func.func @_dense_layer_b_kernel(%arg0: i32, %arg1: memref<1x4x256xf32, #tpu.memory_space<vmem>>, %arg2: memref<4x1xf32, #tpu.memory_space<vmem>>, %arg3: memref<4x1xf32, #tpu.memory_space<vmem>>, %arg4: memref<32x4xf32, #tpu.memory_space<vmem>>, %arg5: memref<32x1xf32, #tpu.memory_space<vmem>>, %arg6: memref<9x8x32xf32, #tpu.memory_space<vmem>>, %arg7: memref<9x1x256xf32, #tpu.memory_space<vmem>>, %arg8: memref<1x8x256xf32, #tpu.memory_space<vmem>>) attributes {dimension_semantics = [#tpu.dimension_semantics<parallel>], iteration_bounds = array<i64: 2>, scalar_prefetch = 0 : i64, scratch_operands = 0 : i64, tpu.core_type = #tpu.core_type<tc>, window_params = [{transform_indices = @transform_0, window_bounds = array<i64: 1, 4, 256>}, {pipeline_mode = #tpu.pipeline_mode<synchronous>, transform_indices = @transform_1, window_bounds = array<i64: 4, 1>}, {pipeline_mode = #tpu.pipeline_mode<synchronous>, transform_indices = @transform_2, window_bounds = array<i64: 4, 1>}, {pipeline_mode = #tpu.pipeline_mode<synchronous>, transform_indices = @transform_3, window_bounds = array<i64: 32, 4>}, {pipeline_mode = #tpu.pipeline_mode<synchronous>, transform_indices = @transform_4, window_bounds = array<i64: 32, 1>}, {pipeline_mode = #tpu.pipeline_mode<synchronous>, transform_indices = @transform_5, window_bounds = array<i64: 9, 8, 32>}, {pipeline_mode = #tpu.pipeline_mode<synchronous>, transform_indices = @transform_6, window_bounds = array<i64: 9, 1, 256>}, {transform_indices = @transform_7, window_bounds = array<i64: 1, 8, 256>}]} {
    %c0 = arith.constant 0 : index
    %c0_0 = arith.constant 0 : index
    %c0_1 = arith.constant 0 : index
    %0 = vector.load %arg1[%c0, %c0_0, %c0_1] : memref<1x4x256xf32, #tpu.memory_space<vmem>>, vector<1x4x256xf32>
    %1 = vector.shape_cast %0 : vector<1x4x256xf32> to vector<4x256xf32>
    %c0_2 = arith.constant 0 : index
    %c0_3 = arith.constant 0 : index
    %2 = vector.load %arg2[%c0_2, %c0_3] : memref<4x1xf32, #tpu.memory_space<vmem>>, vector<4x1xf32>
    %3 = vector.broadcast %2 : vector<4x1xf32> to vector<4x256xf32>
    %4 = arith.mulf %1, %3 : vector<4x256xf32>
    %c0_4 = arith.constant 0 : index
    %c0_5 = arith.constant 0 : index
    %5 = vector.load %arg3[%c0_4, %c0_5] : memref<4x1xf32, #tpu.memory_space<vmem>>, vector<4x1xf32>
    %6 = vector.broadcast %5 : vector<4x1xf32> to vector<4x256xf32>
    %7 = arith.addf %4, %6 : vector<4x256xf32>
    %cst = arith.constant 0.000000e+00 : f32
    %8 = vector.broadcast %cst : f32 to vector<4x256xf32>
    %9 = arith.maximumf %7, %8 : vector<4x256xf32>
    %c0_6 = arith.constant 0 : index
    %c0_7 = arith.constant 0 : index
    %10 = vector.load %arg4[%c0_6, %c0_7] : memref<32x4xf32, #tpu.memory_space<vmem>>, vector<32x4xf32>
    %cst_8 = arith.constant dense<0.000000e+00> : vector<32x256xf32>
    %11 = tpu.matmul %10, %9, %cst_8 {dimension_numbers = #tpu.dot_dimension_numbers<[1], [0], [0], [1], [0, 0, 1, 1], [], []>} : vector<32x4xf32>, vector<4x256xf32>, vector<32x256xf32> -> vector<32x256xf32>
    %c0_9 = arith.constant 0 : index
    %c0_10 = arith.constant 0 : index
    %12 = vector.load %arg5[%c0_9, %c0_10] : memref<32x1xf32, #tpu.memory_space<vmem>>, vector<32x1xf32>
    %13 = vector.broadcast %12 : vector<32x1xf32> to vector<32x256xf32>
    %14 = arith.addf %11, %13 : vector<32x256xf32>
    %cst_11 = arith.constant 0.000000e+00 : f32
    %15 = vector.broadcast %cst_11 : f32 to vector<32x256xf32>
    %16 = arith.maximumf %14, %15 : vector<32x256xf32>
    %cst_12 = arith.constant 0.000000e+00 : f32
    %17 = vector.broadcast %cst_12 : f32 to vector<8x256xf32>
    %c17_i32 = arith.constant 17 : i32
    %18 = tpu.dynamic_rotate %16 by %c17_i32 dim 1 : vector<32x256xf32>, i32 -> vector<32x256xf32>
    %c0_13 = arith.constant 0 : index
    %c0_14 = arith.constant 0 : index
    %c0_15 = arith.constant 0 : index
    %19 = vector.load %arg7[%c0_13, %c0_14, %c0_15] : memref<9x1x256xf32, #tpu.memory_space<vmem>>, vector<1x1x256xf32>
    %20 = vector.shape_cast %19 : vector<1x1x256xf32> to vector<1x256xf32>
    %21 = vector.broadcast %20 : vector<1x256xf32> to vector<32x256xf32>
    %22 = arith.mulf %18, %21 : vector<32x256xf32>
    %c0_16 = arith.constant 0 : index
    %c0_17 = arith.constant 0 : index
    %c0_18 = arith.constant 0 : index
    %23 = vector.load %arg6[%c0_16, %c0_17, %c0_18] : memref<9x8x32xf32, #tpu.memory_space<vmem>>, vector<1x8x32xf32>
    %24 = vector.shape_cast %23 : vector<1x8x32xf32> to vector<8x32xf32>
    %cst_19 = arith.constant dense<0.000000e+00> : vector<8x256xf32>
    %25 = tpu.matmul %24, %22, %cst_19 {dimension_numbers = #tpu.dot_dimension_numbers<[1], [0], [0], [1], [0, 0, 1, 1], [], []>} : vector<8x32xf32>, vector<32x256xf32>, vector<8x256xf32> -> vector<8x256xf32>
    %26 = arith.addf %17, %25 : vector<8x256xf32>
    %c16_i32 = arith.constant 16 : i32
    %27 = tpu.dynamic_rotate %16 by %c16_i32 dim 1 : vector<32x256xf32>, i32 -> vector<32x256xf32>
    %c1 = arith.constant 1 : index
    %c0_20 = arith.constant 0 : index
    %c0_21 = arith.constant 0 : index
    %28 = vector.load %arg7[%c1, %c0_20, %c0_21] : memref<9x1x256xf32, #tpu.memory_space<vmem>>, vector<1x1x256xf32>
    %29 = vector.shape_cast %28 : vector<1x1x256xf32> to vector<1x256xf32>
    %30 = vector.broadcast %29 : vector<1x256xf32> to vector<32x256xf32>
    %31 = arith.mulf %27, %30 : vector<32x256xf32>
    %c1_22 = arith.constant 1 : index
    %c0_23 = arith.constant 0 : index
    %c0_24 = arith.constant 0 : index
    %32 = vector.load %arg6[%c1_22, %c0_23, %c0_24] : memref<9x8x32xf32, #tpu.memory_space<vmem>>, vector<1x8x32xf32>
    %33 = vector.shape_cast %32 : vector<1x8x32xf32> to vector<8x32xf32>
    %cst_25 = arith.constant dense<0.000000e+00> : vector<8x256xf32>
    %34 = tpu.matmul %33, %31, %cst_25 {dimension_numbers = #tpu.dot_dimension_numbers<[1], [0], [0], [1], [0, 0, 1, 1], [], []>} : vector<8x32xf32>, vector<32x256xf32>, vector<8x256xf32> -> vector<8x256xf32>
    %35 = arith.addf %26, %34 : vector<8x256xf32>
    %c15_i32 = arith.constant 15 : i32
    %36 = tpu.dynamic_rotate %16 by %c15_i32 dim 1 : vector<32x256xf32>, i32 -> vector<32x256xf32>
    %c2 = arith.constant 2 : index
    %c0_26 = arith.constant 0 : index
    %c0_27 = arith.constant 0 : index
    %37 = vector.load %arg7[%c2, %c0_26, %c0_27] : memref<9x1x256xf32, #tpu.memory_space<vmem>>, vector<1x1x256xf32>
    %38 = vector.shape_cast %37 : vector<1x1x256xf32> to vector<1x256xf32>
    %39 = vector.broadcast %38 : vector<1x256xf32> to vector<32x256xf32>
    %40 = arith.mulf %36, %39 : vector<32x256xf32>
    %c2_28 = arith.constant 2 : index
    %c0_29 = arith.constant 0 : index
    %c0_30 = arith.constant 0 : index
    %41 = vector.load %arg6[%c2_28, %c0_29, %c0_30] : memref<9x8x32xf32, #tpu.memory_space<vmem>>, vector<1x8x32xf32>
    %42 = vector.shape_cast %41 : vector<1x8x32xf32> to vector<8x32xf32>
    %cst_31 = arith.constant dense<0.000000e+00> : vector<8x256xf32>
    %43 = tpu.matmul %42, %40, %cst_31 {dimension_numbers = #tpu.dot_dimension_numbers<[1], [0], [0], [1], [0, 0, 1, 1], [], []>} : vector<8x32xf32>, vector<32x256xf32>, vector<8x256xf32> -> vector<8x256xf32>
    %44 = arith.addf %35, %43 : vector<8x256xf32>
    %c1_i32 = arith.constant 1 : i32
    %45 = tpu.dynamic_rotate %16 by %c1_i32 dim 1 : vector<32x256xf32>, i32 -> vector<32x256xf32>
    %c3 = arith.constant 3 : index
    %c0_32 = arith.constant 0 : index
    %c0_33 = arith.constant 0 : index
    %46 = vector.load %arg7[%c3, %c0_32, %c0_33] : memref<9x1x256xf32, #tpu.memory_space<vmem>>, vector<1x1x256xf32>
    %47 = vector.shape_cast %46 : vector<1x1x256xf32> to vector<1x256xf32>
    %48 = vector.broadcast %47 : vector<1x256xf32> to vector<32x256xf32>
    %49 = arith.mulf %45, %48 : vector<32x256xf32>
    %c3_34 = arith.constant 3 : index
    %c0_35 = arith.constant 0 : index
    %c0_36 = arith.constant 0 : index
    %50 = vector.load %arg6[%c3_34, %c0_35, %c0_36] : memref<9x8x32xf32, #tpu.memory_space<vmem>>, vector<1x8x32xf32>
    %51 = vector.shape_cast %50 : vector<1x8x32xf32> to vector<8x32xf32>
    %cst_37 = arith.constant dense<0.000000e+00> : vector<8x256xf32>
    %52 = tpu.matmul %51, %49, %cst_37 {dimension_numbers = #tpu.dot_dimension_numbers<[1], [0], [0], [1], [0, 0, 1, 1], [], []>} : vector<8x32xf32>, vector<32x256xf32>, vector<8x256xf32> -> vector<8x256xf32>
    %53 = arith.addf %44, %52 : vector<8x256xf32>
    %c4 = arith.constant 4 : index
    %c0_38 = arith.constant 0 : index
    %c0_39 = arith.constant 0 : index
    %54 = vector.load %arg6[%c4, %c0_38, %c0_39] : memref<9x8x32xf32, #tpu.memory_space<vmem>>, vector<1x8x32xf32>
    %55 = vector.shape_cast %54 : vector<1x8x32xf32> to vector<8x32xf32>
    %cst_40 = arith.constant dense<0.000000e+00> : vector<8x256xf32>
    %56 = tpu.matmul %55, %16, %cst_40 {dimension_numbers = #tpu.dot_dimension_numbers<[1], [0], [0], [1], [0, 0, 1, 1], [], []>} : vector<8x32xf32>, vector<32x256xf32>, vector<8x256xf32> -> vector<8x256xf32>
    %57 = arith.addf %53, %56 : vector<8x256xf32>
    %c255_i32 = arith.constant 255 : i32
    %58 = tpu.dynamic_rotate %16 by %c255_i32 dim 1 : vector<32x256xf32>, i32 -> vector<32x256xf32>
    %c5 = arith.constant 5 : index
    %c0_41 = arith.constant 0 : index
    %c0_42 = arith.constant 0 : index
    %59 = vector.load %arg7[%c5, %c0_41, %c0_42] : memref<9x1x256xf32, #tpu.memory_space<vmem>>, vector<1x1x256xf32>
    %60 = vector.shape_cast %59 : vector<1x1x256xf32> to vector<1x256xf32>
    %61 = vector.broadcast %60 : vector<1x256xf32> to vector<32x256xf32>
    %62 = arith.mulf %58, %61 : vector<32x256xf32>
    %c5_43 = arith.constant 5 : index
    %c0_44 = arith.constant 0 : index
    %c0_45 = arith.constant 0 : index
    %63 = vector.load %arg6[%c5_43, %c0_44, %c0_45] : memref<9x8x32xf32, #tpu.memory_space<vmem>>, vector<1x8x32xf32>
    %64 = vector.shape_cast %63 : vector<1x8x32xf32> to vector<8x32xf32>
    %cst_46 = arith.constant dense<0.000000e+00> : vector<8x256xf32>
    %65 = tpu.matmul %64, %62, %cst_46 {dimension_numbers = #tpu.dot_dimension_numbers<[1], [0], [0], [1], [0, 0, 1, 1], [], []>} : vector<8x32xf32>, vector<32x256xf32>, vector<8x256xf32> -> vector<8x256xf32>
    %66 = arith.addf %57, %65 : vector<8x256xf32>
    %c241_i32 = arith.constant 241 : i32
    %67 = tpu.dynamic_rotate %16 by %c241_i32 dim 1 : vector<32x256xf32>, i32 -> vector<32x256xf32>
    %c6 = arith.constant 6 : index
    %c0_47 = arith.constant 0 : index
    %c0_48 = arith.constant 0 : index
    %68 = vector.load %arg7[%c6, %c0_47, %c0_48] : memref<9x1x256xf32, #tpu.memory_space<vmem>>, vector<1x1x256xf32>
    %69 = vector.shape_cast %68 : vector<1x1x256xf32> to vector<1x256xf32>
    %70 = vector.broadcast %69 : vector<1x256xf32> to vector<32x256xf32>
    %71 = arith.mulf %67, %70 : vector<32x256xf32>
    %c6_49 = arith.constant 6 : index
    %c0_50 = arith.constant 0 : index
    %c0_51 = arith.constant 0 : index
    %72 = vector.load %arg6[%c6_49, %c0_50, %c0_51] : memref<9x8x32xf32, #tpu.memory_space<vmem>>, vector<1x8x32xf32>
    %73 = vector.shape_cast %72 : vector<1x8x32xf32> to vector<8x32xf32>
    %cst_52 = arith.constant dense<0.000000e+00> : vector<8x256xf32>
    %74 = tpu.matmul %73, %71, %cst_52 {dimension_numbers = #tpu.dot_dimension_numbers<[1], [0], [0], [1], [0, 0, 1, 1], [], []>} : vector<8x32xf32>, vector<32x256xf32>, vector<8x256xf32> -> vector<8x256xf32>
    %75 = arith.addf %66, %74 : vector<8x256xf32>
    %c240_i32 = arith.constant 240 : i32
    %76 = tpu.dynamic_rotate %16 by %c240_i32 dim 1 : vector<32x256xf32>, i32 -> vector<32x256xf32>
    %c7 = arith.constant 7 : index
    %c0_53 = arith.constant 0 : index
    %c0_54 = arith.constant 0 : index
    %77 = vector.load %arg7[%c7, %c0_53, %c0_54] : memref<9x1x256xf32, #tpu.memory_space<vmem>>, vector<1x1x256xf32>
    %78 = vector.shape_cast %77 : vector<1x1x256xf32> to vector<1x256xf32>
    %79 = vector.broadcast %78 : vector<1x256xf32> to vector<32x256xf32>
    %80 = arith.mulf %76, %79 : vector<32x256xf32>
    %c7_55 = arith.constant 7 : index
    %c0_56 = arith.constant 0 : index
    %c0_57 = arith.constant 0 : index
    %81 = vector.load %arg6[%c7_55, %c0_56, %c0_57] : memref<9x8x32xf32, #tpu.memory_space<vmem>>, vector<1x8x32xf32>
    %82 = vector.shape_cast %81 : vector<1x8x32xf32> to vector<8x32xf32>
    %cst_58 = arith.constant dense<0.000000e+00> : vector<8x256xf32>
    %83 = tpu.matmul %82, %80, %cst_58 {dimension_numbers = #tpu.dot_dimension_numbers<[1], [0], [0], [1], [0, 0, 1, 1], [], []>} : vector<8x32xf32>, vector<32x256xf32>, vector<8x256xf32> -> vector<8x256xf32>
    %84 = arith.addf %75, %83 : vector<8x256xf32>
    %c239_i32 = arith.constant 239 : i32
    %85 = tpu.dynamic_rotate %16 by %c239_i32 dim 1 : vector<32x256xf32>, i32 -> vector<32x256xf32>
    %c8 = arith.constant 8 : index
    %c0_59 = arith.constant 0 : index
    %c0_60 = arith.constant 0 : index
    %86 = vector.load %arg7[%c8, %c0_59, %c0_60] : memref<9x1x256xf32, #tpu.memory_space<vmem>>, vector<1x1x256xf32>
    %87 = vector.shape_cast %86 : vector<1x1x256xf32> to vector<1x256xf32>
    %88 = vector.broadcast %87 : vector<1x256xf32> to vector<32x256xf32>
    %89 = arith.mulf %85, %88 : vector<32x256xf32>
    %c8_61 = arith.constant 8 : index
    %c0_62 = arith.constant 0 : index
    %c0_63 = arith.constant 0 : index
    %90 = vector.load %arg6[%c8_61, %c0_62, %c0_63] : memref<9x8x32xf32, #tpu.memory_space<vmem>>, vector<1x8x32xf32>
    %91 = vector.shape_cast %90 : vector<1x8x32xf32> to vector<8x32xf32>
    %cst_64 = arith.constant dense<0.000000e+00> : vector<8x256xf32>
    %92 = tpu.matmul %91, %89, %cst_64 {dimension_numbers = #tpu.dot_dimension_numbers<[1], [0], [0], [1], [0, 0, 1, 1], [], []>} : vector<8x32xf32>, vector<32x256xf32>, vector<8x256xf32> -> vector<8x256xf32>
    %93 = arith.addf %84, %92 : vector<8x256xf32>
    %c0_65 = arith.constant 0 : index
    %c0_66 = arith.constant 0 : index
    %c0_67 = arith.constant 0 : index
    %94 = vector.load %arg8[%c0_65, %c0_66, %c0_67] : memref<1x8x256xf32, #tpu.memory_space<vmem>>, vector<1x8x256xf32>
    %95 = vector.shape_cast %94 : vector<1x8x256xf32> to vector<8x256xf32>
    %96 = vector.shape_cast %93 : vector<8x256xf32> to vector<1x8x256xf32>
    tpu.vector_store %arg8[%c0_65, %c0_66, %c0_67], %96 {strides = array<i32>} : memref<1x8x256xf32, #tpu.memory_space<vmem>>, vector<1x8x256xf32>,
    return
  }
  func.func @transform_0(%arg0: i32) -> (i32, i32, i32) {
    %c0_i32 = arith.constant 0 : i32
    %c0_i32_0 = arith.constant 0 : i32
    %c0_i32_1 = arith.constant 0 : i32
    return %arg0, %c0_i32, %c0_i32_0 : i32, i32, i32
  }
  func.func @transform_1(%arg0: i32) -> (i32, i32) {
    %c0_i32 = arith.constant 0 : i32
    %c0_i32_0 = arith.constant 0 : i32
    %c0_i32_1 = arith.constant 0 : i32
    return %c0_i32, %c0_i32_0 : i32, i32
  }
  func.func @transform_2(%arg0: i32) -> (i32, i32) {
    %c0_i32 = arith.constant 0 : i32
    %c0_i32_0 = arith.constant 0 : i32
    %c0_i32_1 = arith.constant 0 : i32
    return %c0_i32, %c0_i32_0 : i32, i32
  }
  func.func @transform_3(%arg0: i32) -> (i32, i32) {
    %c0_i32 = arith.constant 0 : i32
    %c0_i32_0 = arith.constant 0 : i32
    %c0_i32_1 = arith.constant 0 : i32
    return %c0_i32, %c0_i32_0 : i32, i32
  }
  func.func @transform_4(%arg0: i32) -> (i32, i32) {
    %c0_i32 = arith.constant 0 : i32
    %c0_i32_0 = arith.constant 0 : i32
    %c0_i32_1 = arith.constant 0 : i32
    return %c0_i32, %c0_i32_0 : i32, i32
  }
  func.func @transform_5(%arg0: i32) -> (i32, i32, i32) {
    %c0_i32 = arith.constant 0 : i32
    %c0_i32_0 = arith.constant 0 : i32
    %c0_i32_1 = arith.constant 0 : i32
    %c0_i32_2 = arith.constant 0 : i32
    return %c0_i32, %c0_i32_0, %c0_i32_1 : i32, i32, i32
  }
  func.func @transform_6(%arg0: i32) -> (i32, i32, i32) {
    %c0_i32 = arith.constant 0 : i32
    %c0_i32_0 = arith.constant 0 : i32
    %c0_i32_1 = arith.constant 0 : i32
    %c0_i32_2 = arith.constant 0 : i32
    return %c0_i32, %c0_i32_0, %c0_i32_1 : i32, i32, i32
  }
  func.func @transform_7(%arg0: i32) -> (i32, i32, i32) {
    %c0_i32 = arith.constant 0 : i32
    %c0_i32_0 = arith.constant 0 : i32
    %c0_i32_1 = arith.constant 0 : i32
    return %arg0, %c0_i32, %c0_i32_0 : i32, i32, i32
  }
}

</mosaic_0001>

<bundles_post_ra>
// kernel: tpu_custom_call.1
= control target key start
LH: loop header
LB: loop body
LE: loop exit
PB: predicated region body
PF: predicated region fallthrough
CT: control target
= control target key end

     0   :  { %12 = vsyncpa [#allocation3], 0  ;;  %s2118_s0 = inlined_call_operand.vmem [shape: f32[2,4,256], index: 0, kind: input, shape index: {}]   ;;  %s2119_s1 = inlined_call_operand.vmem [shape: f32[4,1], index: 1, kind: input, shape index: {}]   ;;  %s2120_s2 = inlined_call_operand.vmem [shape: f32[4,1], index: 2, kind: input, shape index: {}]   ;;  %s2121_s3 = inlined_call_operand.vmem [shape: f32[32,4], index: 3, kind: input, shape index: {}]   ;;  %s2122_s4 = inlined_call_operand.vmem [shape: f32[32,1], index: 4, kind: input, shape index: {}]   ;;  %s2123_s5 = inlined_call_operand.hbm [shape: f32[9,8,32], index: 5, kind: input, shape index: {}]   ;;  %s2124_s6 = inlined_call_operand.vmem [shape: f32[9,1,256], index: 6, kind: input, shape index: {}]   ;;  %s2125_s7 = inlined_call_operand.hbm [shape: f32[2,8,256], index: 7, kind: output, shape index: {}]  }
   0x1   :  { %13 = vsyncpa [#allocation4], 0 }
   0x2   :  { %15 = vsyncpa [#allocation4 + $0x1], 0  ;;  %s1531_s24 = smov 0   ;;  %s1533_s25 = smov 0  }
   0x3   :  { %s1535_s26 = smov 0   ;;  %s1537_s27 = smov 0  }
   0x4 LB: > { %s1552_s28 = sadd.s32 4294967295, %s1476_s27   ;;  %s1264_s29 = sadd.s32 4294967294, %s1476_s27   ;;  %s1476_s27 = sphi %s1537_s27, %s2131_s27   ;;  %s1472_s26 = sphi %s1535_s26, %s2130_s26   ;;  %s1468_s25 = sphi %s1533_s25, %s2129_s25   ;;  %s1464_s24 = sphi %s1531_s24, %s2128_s24  }
   0x5   : > { %s1556_s30 = sadd.s32 1, %s1476_s27   ;;  %s180_s8 = sadd.s32 1, %s1472_s26 }
   0x6   : > { %s177_s9 = ssub.s32 %s1476_s27, %s1556_s30  ;;  %p190_p0 = scmp.ne.s32.totalorder %s1472_s26, %s1468_s25 }
   0x7   : > { %p178_p1 = scmp.eq.s32.totalorder %s177_s9, 0  ;;  %p191_p2 = scmp.eq.s32.totalorder %s1552_s28, 1 }
   0x8   : > { %p196_p3 = scmp.ne.s32.totalorder %s1468_s25, %s1464_s24  ;;  %p197_p4 = scmp.eq.s32.totalorder %s1264_s29, 1 }
   0x9   : > { %s1567_s10 = scalar_select %p178_p1, %s1472_s26, %s180_s8  }
   0xa   : > { %p1569_p5 = por %p191_p2, %p190_p0  ;;  %p1573_p6 = por %p197_p4, %p196_p3 }
   0xb   : > { %p1265_p7 = scmp.ge.s32.totalorder %s1476_s27, 1  ;;  %p204_p8 = scmp.lt.s32.totalorder %s1476_s27, 3 }
   0xc   : > { %p1329_p9 = scmp.eq.s32.totalorder %s1552_s28, 0  ;;  %s227_s15 = sshll.u32 %s2123_s5, 4  ;;  %s228_s15 = int_to_ptr.hbm [resolvable:$true] %s227_s15 }
   0xd   : > { %p205_p10 = pnand %p1265_p7, %p204_p8  ;;  %s1478_s16 = smov [#allocation2]  }
   0xe   : > { %s229_s17 = sshll.u32 %s1478_s16, 4  ;;  %s1479_s18 = smov 128   ;;  %s230_s17 = int_to_ptr.vmem [resolvable:$true] %s229_s17 }
   0xf   : > { %p1321_p11 = pneg %p205_p10  ;;  %s1480_s19 = smov 8  }
  0x10   : > { %256 = sbr.rel (%p205_p10) target bundleno = 713 (0x2c9), region = 48 }
  0x11   : > { %p1322_p12 = pnand %p1329_p9, %p1321_p11 }
  0x13   : > { %1324 = dma.hbm_to_vmem [thread:$0]  (!%p1322_p12), %s228_s15, 1152, %s230_s17, [#allocation3], %s1479_s18, %s1479_s18, %s1480_s19  }
  0x15   : > { %1455 = dma.done.wait (%p1329_p9), [#allocation3], 1152  }
  0x16   : > { %1457 = vsyncadd (%p1329_p9), [#allocation3], 4294966144  ;;  %v1481_v0 = vmov 0   ;;  %v295_v1 = vld [vmem:[%s2119_s1] sm:$0xf]  ;;  %p289_p13 = scmp.lt.s32.totalorder %s1552_s28, 1  ;;  %v450_v54 = vlaneseq }
  0x17   : > { %1377 = vset.pattern.permute.xlu0 %v1481_v0  ;;  %1379 = vset.pattern.permute.xlu2 %v1481_v0  ;;  %v306_v2 = vld [vmem:[%s2120_s2] sm:$0xf]  ;;  %v1482_v3 = vmov 839922192   ;;  %v323_v10 = vld [vmem:[%s2122_s4 + $0x8] sm:$0xff]  ;;  %v325_v16 = vld [vmem:[%s2122_s4 + $0x18] sm:$0xff] }
  0x18   : > { %1378 = vset.pattern.permute.xlu1 %v1481_v0  ;;  %298 = vperm.xlu0 %1377, %v295_v1   ;;  %s290_s29 = scalar_select %p289_p13, %s1552_s28, 1  ;;  %v301_v4 = vunpack.c.l.s4 %v1482_v3  ;;  %v322_v15 = vld [vmem:[%s2122_s4] sm:$0xff]  ;;  %vm363_vm0 = vcmask 1043456   ;;  %vm350_vm1 = vcmask 31744   ;;  %v324_v18 = vld [vmem:[%s2122_s4 + $0x10] sm:$0xff]  ;;  %v319_v21 = vld [vmem:[%s2121_s3 + $0x8] sm:$0xff] }
  0x19   : > { %333 = vperm.xlu2 %1379, %v323_v10   ;;  %343 = vperm.xlu1 %1378, %v325_v16   ;;  %v318_v17 = vld [vmem:[%s2121_s3] sm:$0xff]  ;;  %v320_v22 = vld [vmem:[%s2121_s3 + $0x10] sm:$0xff]  ;;  %v321_v23 = vld [vmem:[%s2121_s3 + $0x18] sm:$0xff]  ;;  %s1483_s17 = smov 16   ;;  %s1484_s18 = smov 17   ;;  %v1740_v56 = vand.u32 127, %v450_v54 }
  0x1a   : > { %s1313_s8 = sshll.u32 %s290_s29, 3  ;;  %v302_v6 = vunpack.c.0.s8 %v301_v4  ;;  %s1485_s19 = smov 15   ;;  %vm518_vm9 = vcmask 261120  }
  0x1b   : > { %s293_s14 = scalar_lea.vmem %s2118_s0, %s1313_s8  ;;  %s1486_s20 = smov 1   ;;  %vm492_vm2 = vcmp.lt.s32.totalorder %v1740_v56, 16  ;;  %vm621_vm3 = vcmp.lt.s32.totalorder %v1740_v56, 15  ;;  %vm452_vm4 = vcmp.lt.s32.totalorder %v1740_v56, 17  ;;  %vm708_vm5 = vcmp.lt.s32.totalorder %v1740_v56, 1 }
  0x1c   : > { %v294_v8 = vld [vmem:[%s293_s14] sm:$0xff]  ;;  %s1487_s21 = smov 127   ;;  %s1488_s22 = smov 113   ;;  %vm929_vm6 = vcmp.lt.s32.totalorder %v1740_v56, 113  ;;  %vm842_vm7 = vcmp.lt.s32.totalorder %v1740_v56, 127  ;;  %vm1016_vm8 = vcmp.lt.s32.totalorder %v1740_v56, 112 }
  0x1d   : > { %s1489_s23 = smov 112   ;;  %s1490_s29 = smov 111   ;;  %vm1103_vm10 = vcmp.lt.s32.totalorder %v1740_v56, 111 }
  0x1e   : > { %s286_s13 = sand.u32 1, %s1468_s25   ;;  %s1314_s15 = sshll.u32 %s1552_s28, 4 }
  0x1f   : > { %s1270_s14 = sshll.u32 %s286_s13, 4  ;;  %s1177_s28 = scalar_lea.sflag [#allocation4], %s286_s13 }
  0x20   : > { %309 = vperm.xlu0 %1377, %v306_v2   ;;  %s1430_s9 = scalar_lea.hbm %s2125_s7, 32 }
  0x21   : > { %328 = vperm.xlu2 %1379, %v322_v15   ;;  %338 = vperm.xlu1 %1378, %v324_v18  }
  0x73   : > { %v334_v24 = vpop.permute.xlu2 %333 }
  0x7b   : > { %v329_v25 = vpop.permute.xlu2 %328 }
  0x8a   : > { %v299_v5 = vpop.permute.xlu0 %298 }
  0x8b   : > { %v303_v7 = vperm.slane %v299_v5, %v302_v6  ;;  %v344_v34 = vpop.permute.xlu1 %343 }
  0x8d   : > { %v305_v11 = vmul.f32 %v303_v7, %v294_v8 }
  0x92   : > { %v310_v9 = vpop.permute.xlu0 %309 }
  0x93   : > { %v314_v12 = vperm.slane %v310_v9, %v302_v6  ;;  %v339_v37 = vpop.permute.xlu1 %338 }
  0x95   : > { %v316_v13 = vadd.f32 %v314_v12, %v305_v11 }
  0x97   : > { %v317_v14 = vmax.f32 %v316_v13, 0.0 }
  0x99   : > { %347 = vst [vmem:[#allocation1] ss:$2 sm:$0xff] %v317_v14 }
  0xa0   : > { %v348_v19 = vld.sshfl [vmem:[#allocation1] sm:$0xff pattern:$0x75316420]  ;;  %v349_v20 = vld.sshfl [vmem:[#allocation1 + $0x8] sm:$0xff pattern:$0x75316420] }
  0xa1   : > { %1273 = vmatpush.msk.msra.mxu0 %vm363_vm0, %v348_v19  ;;  %1278 = vmatpush.msk.msra.mxu1 %vm363_vm0, %v349_v20 }
  0xa2   : > { %1274 = vmatmul.msk.f32.vlgmr.msra.gmra.mxu0 %vm350_vm1, %v318_v17  ;;  %1279 = vmatmul.msk.f32.vlgmr.msra.gmra.mxu1 %vm350_vm1, %v318_v17 }
  0xaa   : > { %1275 = vmatmul.msk.f32.gmra.mxu0 %vm350_vm1, %v319_v21  ;;  %1280 = vmatmul.msk.f32.gmra.mxu1 %vm350_vm1, %v319_v21 }
  0xb2   : > { %1276 = vmatmul.msk.f32.gmra.mxu0 %vm350_vm1, %v320_v22  ;;  %1281 = vmatmul.msk.f32.gmra.mxu1 %vm350_vm1, %v320_v22 }
  0xba   : > { %1277 = vmatmul.msk.f32.gmra.mxu0 %vm350_vm1, %v321_v23  ;;  %1282 = vmatmul.msk.f32.gmra.mxu1 %vm350_vm1, %v321_v23 }
 0x11f   : > { %v385_v26 = vpop.f32.mrf.mxu0  ;;  %v414_v27 = vpop.f32.mrf.mxu1 }
 0x120   : > { %v386_v28 = vadd.f32 %v385_v26, %v329_v25  ;;  %v415_v29 = vadd.f32 %v414_v27, %v329_v25 }
 0x122   : > { %v1632_v30 = vmax.f32 %v386_v28, 0.0  ;;  %v1634_v31 = vmax.f32 %v415_v29, 0.0 }
 0x124   : > { %484 = vrot.lane.b32.xlu1 %v1634_v31, %s1483_s17  ;;  %434 = vrot.lane.b32.xlu2 %v1632_v30, %s1484_s18 }
 0x125   : > { %476 = vrot.lane.b32.xlu0 %v1632_v30, %s1483_s17 }
 0x127   : > { %v388_v32 = vpop.f32.mrf.mxu0  ;;  %v417_v33 = vpop.f32.mrf.mxu1 }
 0x128   : > { %v389_v44 = vadd.f32 %v388_v32, %v334_v24  ;;  %v418_v48 = vadd.f32 %v417_v33, %v334_v24 }
 0x12a   : > { %v1668_v50 = vmax.f32 %v389_v44, 0.0  ;;  %v1673_v51 = vmax.f32 %v418_v48, 0.0 }
 0x12c   : > { %605 = vrot.lane.b32.xlu1 %v1632_v30, %s1485_s19  ;;  %613 = vrot.lane.b32.xlu2 %v1634_v31, %s1485_s19 }
 0x12d   : > { %442 = vrot.lane.b32.xlu0 %v1634_v31, %s1484_s18 }
 0x12f   : > { %v391_v35 = vpop.f32.mrf.mxu0  ;;  %v420_v36 = vpop.f32.mrf.mxu1 }
 0x130   : > { %v392_v38 = vadd.f32 %v391_v35, %v339_v37  ;;  %v421_v41 = vadd.f32 %v420_v36, %v339_v37 }
 0x132   : > { %v1658_v47 = vmax.f32 %v392_v38, 0.0  ;;  %v1660_v49 = vmax.f32 %v421_v41, 0.0 }
 0x134   : > { %700 = vrot.lane.b32.xlu1 %v1634_v31, %s1486_s20  ;;  %826 = vrot.lane.b32.xlu2 %v1632_v30, %s1487_s21 }
 0x135   : > { %692 = vrot.lane.b32.xlu0 %v1632_v30, %s1486_s20 }
 0x137   : > { %v394_v39 = vpop.f32.mrf.mxu0  ;;  %v423_v40 = vpop.f32.mrf.mxu1 }
 0x138   : > { %v395_v42 = vadd.f32 %v394_v39, %v344_v34  ;;  %v424_v43 = vadd.f32 %v423_v40, %v344_v34 }
 0x13a   : > { %v1654_v45 = vmax.f32 %v395_v42, 0.0  ;;  %v1656_v46 = vmax.f32 %v424_v43, 0.0 }
 0x13c   : > { %796 = vmatpush.msrb.mxu0 %v1654_v45  ;;  %816 = vmatpush.msrb.mxu1 %v1656_v46 }
 0x13d   : > { %913 = vrot.lane.b32.xlu1 %v1632_v30, %s1488_s22  ;;  %921 = vrot.lane.b32.xlu2 %v1634_v31, %s1488_s22 }
 0x13e   : > { %834 = vrot.lane.b32.xlu0 %v1634_v31, %s1487_s21  ;;  %797 = vmatpush.msrb.mxu0 %v1658_v47 }
 0x13f   : > { %817 = vmatpush.msrb.mxu1 %v1660_v49 }
 0x140   : > { %798 = vmatpush.msrb.mxu0 %v1668_v50 }
 0x141   : > { %818 = vmatpush.msrb.mxu1 %v1673_v51 }
 0x142   : > { %799 = vmatpush.msrb.mxu0 %v1632_v30 }
 0x143   : > { %819 = vmatpush.msrb.mxu1 %v1634_v31 }
 0x145   : > { %478 = vrot.lane.b32.xlu1 %v1668_v50, %s1483_s17  ;;  %486 = vrot.lane.b32.xlu2 %v1673_v51, %s1483_s17 }
 0x146   : > { %1000 = vrot.lane.b32.xlu0 %v1632_v30, %s1489_s23 }
 0x14d   : > { %444 = vrot.lane.b32.xlu1 %v1673_v51, %s1484_s18  ;;  %607 = vrot.lane.b32.xlu2 %v1668_v50, %s1485_s19 }
 0x14e   : > { %436 = vrot.lane.b32.xlu0 %v1668_v50, %s1484_s18 }
 0x155   : > { %694 = vrot.lane.b32.xlu1 %v1668_v50, %s1486_s20  ;;  %702 = vrot.lane.b32.xlu2 %v1673_v51, %s1486_s20 }
 0x156   : > { %615 = vrot.lane.b32.xlu0 %v1673_v51, %s1485_s19 }
 0x15d   : > { %836 = vrot.lane.b32.xlu1 %v1673_v51, %s1487_s21  ;;  %1002 = vrot.lane.b32.xlu2 %v1668_v50, %s1489_s23 }
 0x15e   : > { %828 = vrot.lane.b32.xlu0 %v1668_v50, %s1487_s21 }
 0x165   : > { %923 = vrot.lane.b32.xlu1 %v1673_v51, %s1488_s22  ;;  %480 = vrot.lane.b32.xlu2 %v1658_v47, %s1483_s17 }
 0x166   : > { %915 = vrot.lane.b32.xlu0 %v1668_v50, %s1488_s22 }
 0x16d   : > { %438 = vrot.lane.b32.xlu1 %v1658_v47, %s1484_s18  ;;  %446 = vrot.lane.b32.xlu2 %v1660_v49, %s1484_s18 }
 0x16e   : > { %1010 = vrot.lane.b32.xlu0 %v1673_v51, %s1489_s23 }
 0x175   : > { %617 = vrot.lane.b32.xlu1 %v1660_v49, %s1485_s19  ;;  %696 = vrot.lane.b32.xlu2 %v1658_v47, %s1486_s20 }
 0x176   : > { %488 = vrot.lane.b32.xlu0 %v1660_v49, %s1483_s17 }
 0x17d   : > { %830 = vrot.lane.b32.xlu1 %v1658_v47, %s1487_s21  ;;  %838 = vrot.lane.b32.xlu2 %v1660_v49, %s1487_s21 }
 0x17e   : > { %609 = vrot.lane.b32.xlu0 %v1658_v47, %s1485_s19  ;;  %v435_v52 = vpop.permute.xlu2 %434 }
 0x185   : > { %1004 = vrot.lane.b32.xlu1 %v1658_v47, %s1489_s23  ;;  %917 = vrot.lane.b32.xlu2 %v1658_v47, %s1488_s22 }
 0x186   : > { %704 = vrot.lane.b32.xlu0 %v1660_v49, %s1486_s20  ;;  %v614_v53 = vpop.permute.xlu2 %613 }
 0x18d   : > { %490 = vrot.lane.b32.xlu1 %v1656_v46, %s1483_s17  ;;  %1012 = vrot.lane.b32.xlu2 %v1660_v49, %s1489_s23 }
 0x18e   : > { %925 = vrot.lane.b32.xlu0 %v1660_v49, %s1488_s22  ;;  %v827_v55 = vpop.permute.xlu2 %826 }
 0x195   : > { %1008 = vrot.lane.b32.xlu1 %v1634_v31, %s1489_s23  ;;  %440 = vrot.lane.b32.xlu2 %v1654_v45, %s1484_s18 }
 0x196   : > { %482 = vrot.lane.b32.xlu0 %v1654_v45, %s1483_s17  ;;  %v485_v57 = vpop.permute.xlu1 %484 }
 0x197   : > { %v922_v58 = vpop.permute.xlu2 %921  ;;  %v477_v59 = vpop.permute.xlu0 %476 }
 0x198   : > { %v1751_v60 = vsel %vm492_vm2, %v477_v59, %v485_v57  ;;  %v1755_v61 = vsel %vm492_vm2, %v485_v57, %v477_v59 }
 0x19d   : > { %611 = vrot.lane.b32.xlu1 %v1654_v45, %s1485_s19  ;;  %619 = vrot.lane.b32.xlu2 %v1656_v46, %s1485_s19  ;;  %s288_s19 = scalar_lea.vmem [#allocation5], %s1270_s14 }
 0x19e   : > { %448 = vrot.lane.b32.xlu0 %v1656_v46, %s1484_s18  ;;  %v606_v62 = vpop.permute.xlu1 %605  ;;  %s1188_s18 = scalar_lea.hbm %s2125_s7, %s1314_s15 }
 0x19f   : > { %v1767_v63 = vsel %vm621_vm3, %v606_v62, %v614_v53  ;;  %v1771_v0 = vsel %vm621_vm3, %v614_v53, %v606_v62  ;;  %v487_v1 = vpop.permute.xlu2 %486  ;;  %v443_v2 = vpop.permute.xlu0 %442  ;;  %v1283_v62 = vld [vmem:[%s2124_s6 + $0x2] sm:$0x3] }
 0x1a0   : > { %v1775_v3 = vsel %vm452_vm4, %v435_v52, %v443_v2  ;;  %v1779_v4 = vsel %vm452_vm4, %v443_v2, %v435_v52 }
 0x1a5   : > { %706 = vrot.lane.b32.xlu1 %v1656_v46, %s1486_s20  ;;  %832 = vrot.lane.b32.xlu2 %v1654_v45, %s1487_s21 }
 0x1a6   : > { %698 = vrot.lane.b32.xlu0 %v1654_v45, %s1486_s20  ;;  %v701_v5 = vpop.permute.xlu1 %700  ;;  %s1190_s20 = sshll.u32 %s288_s19, 4  ;;  %s1191_s20 = int_to_ptr.vmem [resolvable:$true] %s1190_s20 }
 0x1a7   : > { %v608_v6 = vpop.permute.xlu2 %607  ;;  %v693_v7 = vpop.permute.xlu0 %692 }
 0x1a8   : > { %v1790_v8 = vsel %vm708_vm5, %v693_v7, %v701_v5  ;;  %v1794_v9 = vsel %vm708_vm5, %v701_v5, %v693_v7  ;;  %v504_v5 = vperm.slane %v1283_v62, 0 }
 0x1ad   : > { %919 = vrot.lane.b32.xlu1 %v1654_v45, %s1488_s22  ;;  %927 = vrot.lane.b32.xlu2 %v1656_v46, %s1488_s22 }
 0x1ae   : > { %840 = vrot.lane.b32.xlu0 %v1656_v46, %s1487_s21  ;;  %s1192_s21 = sshll.u32 %s1188_s18, 4  ;;  %s1193_s21 = int_to_ptr.hbm [resolvable:$true] %s1192_s21 }
 0x1af   : > { %v914_v10 = vpop.permute.xlu1 %913  ;;  %v703_v14 = vpop.permute.xlu2 %702  ;;  %s1424_s22 = sshra.s32 %s1193_s21, 4  ;;  %s1425_s22 = int_to_ptr.hbm [resolvable:$true] %s1424_s22 }
 0x1b0   : > { %v1806_v11 = vsel %vm929_vm6, %v914_v10, %v922_v58  ;;  %v1810_v12 = vsel %vm929_vm6, %v922_v58, %v914_v10  ;;  %v835_v13 = vpop.permute.xlu0 %834  ;;  %p1431_p3 = scmp.lt.s32.totalorder %s1425_s22, %s2125_s7 }
 0x1b1   : > { %v1814_v15 = vsel %vm842_vm7, %v827_v55, %v835_v13  ;;  %v1818_v16 = vsel %vm842_vm7, %v835_v13, %v827_v55 }
 0x1b5   : > { %1014 = vrot.lane.b32.xlu1 %v1656_v46, %s1489_s23  ;;  %1099 = vrot.lane.b32.xlu2 %v1660_v49, %s1490_s29 }
 0x1b6   : > { %1006 = vrot.lane.b32.xlu0 %v1654_v45, %s1489_s23  ;;  %s1426_s23 = scalar_lea.hbm %s1425_s22, 16 }
 0x1b7   : > { %v479_v17 = vpop.permute.xlu1 %478  ;;  %v1003_v21 = vpop.permute.xlu2 %1002  ;;  %p1427_p0 = scmp.ne.s32.totalorder %s1425_s22, %s1426_s23  ;;  %p1432_p4 = scmp.lt.s32.totalorder %s1430_s9, %s1426_s23 }
 0x1b8   : > { %v1827_v18 = vsel %vm492_vm2, %v479_v17, %v487_v1  ;;  %v1831_v19 = vsel %vm492_vm2, %v487_v1, %v479_v17  ;;  %v1833_v20 = vpop.permute.xlu0 %1000 }
 0x1b9   : > { %p1428_p1 = pnand %p1427_p0, %p1569_p5  ;;  %p1433_p7 = por %p1432_p4, %p1431_p3 }
 0x1bb   : > { %p1429_p2 = pneg %p1428_p1 }
 0x1bd   : > { %1091 = vrot.lane.b32.xlu1 %v1658_v47, %s1490_s29  ;;  %1093 = vrot.lane.b32.xlu2 %v1654_v45, %s1490_s29  ;;  %p1434_p8 = pnand %p1433_p7, %p1429_p2 }
 0x1be   : > { %1089 = vrot.lane.b32.xlu0 %v1668_v50, %s1490_s29 }
 0x1bf   : > { %v445_v22 = vpop.permute.xlu1 %444  ;;  %v481_v26 = vpop.permute.xlu2 %480 }
 0x1c0   : > { %v437_v23 = vpop.permute.xlu0 %436 }
 0x1c1   : > { %v1840_v24 = vsel %vm452_vm4, %v437_v23, %v445_v22  ;;  %v1844_v25 = vsel %vm452_vm4, %v445_v22, %v437_v23 }
 0x1c5   : > { %1097 = vrot.lane.b32.xlu1 %v1673_v51, %s1490_s29  ;;  %1087 = vrot.lane.b32.xlu2 %v1632_v30, %s1490_s29 }
 0x1c6   : > { %1101 = vrot.lane.b32.xlu0 %v1656_v46, %s1490_s29 }
 0x1c7   : > { %v695_v27 = vpop.permute.xlu1 %694  ;;  %v447_v30 = vpop.permute.xlu2 %446 }
 0x1c8   : > { %v1851_v28 = vsel %vm708_vm5, %v695_v27, %v703_v14  ;;  %v1855_v29 = vsel %vm708_vm5, %v703_v14, %v695_v27  ;;  %v616_v32 = vpop.permute.xlu0 %615 }
 0x1c9   : > { %v1859_v33 = vsel %vm621_vm3, %v608_v6, %v616_v32  ;;  %v1863_v34 = vsel %vm621_vm3, %v616_v32, %v608_v6  ;;  %v505_v6 = vperm.slane %v1283_v62, 1  ;;  %v461_v32 = vld [vmem:[%s2124_s6] sm:$0x3] }
 0x1ca   : > { %v464_v62 = vperm.slane %v461_v32, 1 }
 0x1ce   : > { %1095 = vrot.lane.b32.xlu0 %v1634_v31, %s1490_s29 }
 0x1cf   : > { %v837_v35 = vpop.permute.xlu1 %836  ;;  %v1874_v41 = vpop.permute.xlu2 %696 }
 0x1d0   : > { %v829_v36 = vpop.permute.xlu0 %828 }
 0x1d1   : > { %v1868_v37 = vsel %vm842_vm7, %v829_v36, %v837_v35  ;;  %v1872_v38 = vsel %vm842_vm7, %v837_v35, %v829_v36  ;;  %v511_v35 = vmul.f32 %v505_v6, %v1827_v18 }
 0x1d7   : > { %v924_v39 = vpop.permute.xlu1 %923  ;;  %v1893_v47 = vpop.permute.xlu2 %838 }
 0x1d8   : > { %v916_v40 = vpop.permute.xlu0 %915 }
 0x1d9   : > { %v1878_v42 = vsel %vm929_vm6, %v916_v40, %v924_v39  ;;  %v1882_v31 = vsel %vm929_vm6, %v924_v39, %v916_v40  ;;  %v463_v39 = vperm.slane %v461_v32, 0 }
 0x1df   : > { %v439_v43 = vpop.permute.xlu1 %438  ;;  %v1897_v50 = vpop.permute.xlu2 %917 }
 0x1e0   : > { %v1011_v44 = vpop.permute.xlu0 %1010 }
 0x1e1   : > { %v1887_v45 = vsel %vm1016_vm8, %v1003_v21, %v1011_v44  ;;  %v1891_v46 = vsel %vm1016_vm8, %v1011_v44, %v1003_v21  ;;  %v508_v44 = vmul.f32 %v504_v5, %v1755_v61 }
 0x1e7   : > { %v1895_v48 = vpop.permute.xlu1 %617  ;;  %v1903_v53 = vpop.permute.xlu2 %1012 }
 0x1e8   : > { %v489_v49 = vpop.permute.xlu0 %488 }
 0x1e9   : > { %v495_v7 = vsel %vm492_vm2, %v481_v26, %v489_v49  ;;  %v499_v10 = vsel %vm492_vm2, %v489_v49, %v481_v26  ;;  %v510_v26 = vmul.f32 %v504_v5, %v1831_v19  ;;  %v509_v49 = vmul.f32 %v505_v6, %v1751_v60 }
 0x1ea   : > { %v512_v23 = vmul.f32 %v504_v5, %v499_v10  ;;  %v513_v27 = vmul.f32 %v505_v6, %v495_v7  ;;  %v459_v19 = vsel %vm452_vm4, %v447_v30, %v439_v43  ;;  %v780_v10 = vld [vmem:[#allocation2 + $0x20] sm:$0xff] }
 0x1eb   : > { %v471_v60 = vmul.f32 %v463_v39, %v459_v19  ;;  %1294 = vmatmul.msk.f32.vlgmr.msrb.gmra.mxu0 %vm518_vm9, %v780_v10  ;;  %1295 = vmatmul.msk.f32.vlgmr.msrb.gmra.mxu1 %vm518_vm9, %v780_v10 }
 0x1ef   : > { %v1899_v51 = vpop.permute.xlu1 %830  ;;  %v441_v59 = vpop.permute.xlu2 %440 }
 0x1f0   : > { %v1901_v52 = vpop.permute.xlu0 %609 }
 0x1f7   : > { %v1905_v54 = vpop.permute.xlu1 %1004  ;;  %v620_v22 = vpop.permute.xlu2 %619 }
 0x1f8   : > { %v1907_v55 = vpop.permute.xlu0 %704 }
 0x1ff   : > { %v491_v57 = vpop.permute.xlu1 %490 }
 0x200   : > { %v1909_v58 = vpop.permute.xlu0 %925 }
 0x207   : > { %v1914_v1 = vpop.permute.xlu1 %1008 }
 0x208   : > { %v483_v2 = vpop.permute.xlu0 %482 }
 0x209   : > { %v500_v13 = vsel %vm492_vm2, %v491_v57, %v483_v2  ;;  %v496_v14 = vsel %vm492_vm2, %v483_v2, %v491_v57  ;;  %v517_v57 = vld [vmem:[#allocation2 + $0x8] sm:$0xff]  ;;  %v455_v2 = vsel %vm452_vm4, %v439_v43, %v447_v30  ;;  %v1288_v30 = vld [vmem:[%s2124_s6 + $0x4] sm:$0x3]  ;;  %v1944_v43 = vpop.permute.xlu2 %832 }
 0x20a   : > { %v514_v17 = vmul.f32 %v504_v5, %v500_v13  ;;  %v515_v21 = vmul.f32 %v505_v6, %v496_v14  ;;  %v472_v6 = vmul.f32 %v464_v62, %v455_v2  ;;  %v470_v13 = vmul.f32 %v464_v62, %v1840_v24 }
 0x20b   : > { %v468_v24 = vmul.f32 %v464_v62, %v1775_v3  ;;  %v1299_v3 = vld [vmem:[%s2124_s6 + $0xc] sm:$0x3] }
 0x20c   : > { %534 = vmatpush.msra.mxu2 %v514_v17  ;;  %554 = vmatpush.msra.mxu3 %v515_v21 }
 0x20e   : > { %535 = vmatpush.msra.mxu2 %v512_v23  ;;  %555 = vmatpush.msra.mxu3 %v513_v27  ;;  %v633_v23 = vperm.slane %v1288_v30, 0  ;;  %v634_v27 = vperm.slane %v1288_v30, 1 }
 0x20f   : > { %v612_v36 = vpop.permute.xlu1 %611 }
 0x210   : > { %536 = vmatpush.msra.mxu2 %v510_v26  ;;  %556 = vmatpush.msra.mxu3 %v511_v35  ;;  %v449_v40 = vpop.permute.xlu0 %448  ;;  %v625_v14 = vsel %vm621_vm3, %v612_v36, %v620_v22  ;;  %v629_v17 = vsel %vm621_vm3, %v620_v22, %v612_v36  ;;  %v475_v26 = vld [vmem:[#allocation2] sm:$0xff]  ;;  %v624_v22 = vsel %vm621_vm3, %v1901_v52, %v1895_v48  ;;  %v1291_v36 = vld [vmem:[%s2124_s6 + $0x6] sm:$0x3] }
 0x211   : > { %v456_v18 = vsel %vm452_vm4, %v441_v59, %v449_v40  ;;  %v460_v7 = vsel %vm452_vm4, %v449_v40, %v441_v59  ;;  %v469_v59 = vmul.f32 %v463_v39, %v1844_v25  ;;  %v467_v25 = vmul.f32 %v463_v39, %v1779_v4 }
 0x212   : > { %537 = vmatpush.msra.mxu2 %v508_v44  ;;  %557 = vmatpush.msra.mxu3 %v509_v49  ;;  %v473_v61 = vmul.f32 %v463_v39, %v460_v7  ;;  %v474_v5 = vmul.f32 %v464_v62, %v456_v18  ;;  %v628_v35 = vsel %vm621_vm3, %v1895_v48, %v1901_v52  ;;  %v720_v48 = vperm.slane %v1291_v36, 0 }
 0x213   : > { %1284 = vmatmul.msk.f32.vlgmr.msra.gmra.mxu2 %vm518_vm9, %v517_v57  ;;  %1285 = vmatmul.msk.f32.vlgmr.msra.gmra.mxu3 %vm518_vm9, %v517_v57  ;;  %v643_v40 = vmul.f32 %v633_v23, %v629_v17  ;;  %v644_v44 = vmul.f32 %v634_v27, %v625_v14  ;;  %v641_v4 = vmul.f32 %v633_v23, %v628_v35  ;;  %v721_v49 = vperm.slane %v1291_v36, 1 }
 0x214   : > { %577 = vmatpush.msrb.mxu2 %v473_v61  ;;  %597 = vmatpush.msrb.mxu3 %v474_v5  ;;  %v642_v39 = vmul.f32 %v634_v27, %v624_v22  ;;  %v639_v52 = vmul.f32 %v633_v23, %v1863_v34  ;;  %v640_v57 = vmul.f32 %v634_v27, %v1859_v33  ;;  %v941_v7 = vperm.slane %v1299_v3, 0  ;;  %v928_v61 = vpop.permute.xlu2 %927 }
 0x215   : > { %v637_v19 = vmul.f32 %v633_v23, %v1771_v0  ;;  %v638_v18 = vmul.f32 %v634_v27, %v1767_v63  ;;  %v711_v34 = vsel %vm708_vm5, %v1874_v41, %v1907_v55  ;;  %v942_v5 = vperm.slane %v1299_v3, 1  ;;  %v1296_v23 = vld [vmem:[%s2124_s6 + $0xa] sm:$0x3] }
 0x216   : > { %578 = vmatpush.msrb.mxu2 %v471_v60  ;;  %598 = vmatpush.msrb.mxu3 %v472_v6  ;;  %v715_v60 = vsel %vm708_vm5, %v1907_v55, %v1874_v41  ;;  %v729_v55 = vmul.f32 %v721_v49, %v711_v34  ;;  %v726_v27 = vmul.f32 %v720_v48, %v1855_v29  ;;  %v854_v22 = vperm.slane %v1296_v23, 0 }
 0x217   : > { %v707_v21 = vpop.permute.xlu1 %706  ;;  %v728_v41 = vmul.f32 %v720_v48, %v715_v60  ;;  %v725_v29 = vmul.f32 %v721_v49, %v1790_v8  ;;  %v947_v36 = vmul.f32 %v941_v7, %v1878_v42  ;;  %v849_v8 = vsel %vm842_vm7, %v1893_v47, %v1899_v51 }
 0x218   : > { %579 = vmatpush.msrb.mxu2 %v469_v59  ;;  %599 = vmatpush.msrb.mxu3 %v470_v13  ;;  %v699_v32 = vpop.permute.xlu0 %698  ;;  %v646_v59 = vld [vmem:[#allocation2 + $0x10] sm:$0xff]  ;;  %v932_v13 = vsel %vm929_vm6, %v1897_v50, %v1909_v58  ;;  %v945_v42 = vmul.f32 %v941_v7, %v1806_v11  ;;  %v1017_v60 = vsel %vm1016_vm8, %v1833_v20, %v1914_v1 }
 0x219   : > { %v712_v62 = vsel %vm708_vm5, %v699_v32, %v707_v21  ;;  %v716_v2 = vsel %vm708_vm5, %v707_v21, %v699_v32  ;;  %v936_v21 = vsel %vm929_vm6, %v1909_v58, %v1897_v50  ;;  %v727_v32 = vmul.f32 %v721_v49, %v1851_v28 }
 0x21a   : > { %580 = vmatpush.msrb.mxu2 %v467_v25  ;;  %600 = vmatpush.msrb.mxu3 %v468_v24  ;;  %v730_v30 = vmul.f32 %v720_v48, %v716_v2  ;;  %v731_v10 = vmul.f32 %v721_v49, %v712_v62  ;;  %v949_v25 = vmul.f32 %v941_v7, %v932_v13  ;;  %v855_v28 = vperm.slane %v1296_v23, 1 }
 0x21b   : > { %1286 = vmatmul.msk.f32.vlgmr.msrb.gmra.mxu2 %vm518_vm9, %v475_v26  ;;  %1287 = vmatmul.msk.f32.vlgmr.msrb.gmra.mxu3 %vm518_vm9, %v475_v26  ;;  %v950_v24 = vmul.f32 %v942_v5, %v936_v21  ;;  %v724_v26 = vmul.f32 %v720_v48, %v1794_v9  ;;  %v860_v49 = vmul.f32 %v854_v22, %v1868_v37  ;;  %v1041_v21 = vld [vmem:[#allocation2 + $0x38] sm:$0xff] }
 0x21c   : > { %662 = vmatpush.msra.mxu2 %v643_v40  ;;  %682 = vmatpush.msra.mxu3 %v644_v44  ;;  %v948_v40 = vmul.f32 %v942_v5, %v1882_v31  ;;  %v946_v31 = vmul.f32 %v942_v5, %v1810_v12  ;;  %v861_v11 = vmul.f32 %v855_v28, %v1872_v38 }
 0x21d   : > { %v858_v62 = vmul.f32 %v854_v22, %v1814_v15  ;;  %v859_v37 = vmul.f32 %v855_v28, %v1818_v16  ;;  %v1019_v38 = vsel %vm1016_vm8, %v1905_v54, %v1903_v53  ;;  %v867_v16 = vld [vmem:[#allocation2 + $0x28] sm:$0xff] }
 0x21e   : > { %663 = vmatpush.msra.mxu2 %v641_v4  ;;  %683 = vmatpush.msra.mxu3 %v642_v39  ;;  %v733_v4 = vld [vmem:[#allocation2 + $0x18] sm:$0xff]  ;;  %v1302_v39 = vld [vmem:[%s2124_s6 + $0xe] sm:$0x3] }
 0x21f   : > { %v920_v33 = vpop.permute.xlu1 %919  ;;  %v1028_v2 = vperm.slane %v1302_v39, 0 }
 0x220   : > { %664 = vmatpush.msra.mxu2 %v639_v52  ;;  %684 = vmatpush.msra.mxu3 %v640_v57  ;;  %v933_v0 = vsel %vm929_vm6, %v920_v33, %v928_v61  ;;  %v937_v63 = vsel %vm929_vm6, %v928_v61, %v920_v33  ;;  %v841_v6 = vpop.permute.xlu0 %840  ;;  %v863_v52 = vmul.f32 %v855_v28, %v849_v8 }
 0x221   : > { %v951_v14 = vmul.f32 %v941_v7, %v933_v0  ;;  %v952_v17 = vmul.f32 %v942_v5, %v937_v63  ;;  %v846_v50 = vsel %vm842_vm7, %v1944_v43, %v841_v6  ;;  %v850_v58 = vsel %vm842_vm7, %v841_v6, %v1944_v43  ;;  %v1305_v63 = vld [vmem:[%s2124_s6 + $0x10] sm:$0x3] }
 0x222   : > { %665 = vmatpush.msra.mxu2 %v637_v19  ;;  %685 = vmatpush.msra.mxu3 %v638_v18  ;;  %v845_v43 = vsel %vm842_vm7, %v1899_v51, %v1893_v47  ;;  %v864_v9 = vmul.f32 %v854_v22, %v846_v50  ;;  %v865_v3 = vmul.f32 %v855_v28, %v850_v58  ;;  %v1100_v47 = vpop.permute.xlu2 %1099  ;;  %v954_v51 = vld [vmem:[#allocation2 + $0x30] sm:$0xff]  ;;  %v1029_v19 = vperm.slane %v1302_v39, 1 }
 0x223   : > { %1289 = vmatmul.msk.f32.vlgmr.msra.gmra.mxu2 %vm518_vm9, %v646_v59  ;;  %1290 = vmatmul.msk.f32.vlgmr.msra.gmra.mxu3 %vm518_vm9, %v646_v59  ;;  %v862_v48 = vmul.f32 %v854_v22, %v845_v43  ;;  %v1023_v7 = vsel %vm1016_vm8, %v1903_v53, %v1905_v54  ;;  %v1036_v33 = vmul.f32 %v1028_v2, %v1019_v38 }
 0x224   : > { %749 = vmatpush.msrb.mxu2 %v730_v30  ;;  %769 = vmatpush.msrb.mxu3 %v731_v10  ;;  %v1037_v5 = vmul.f32 %v1029_v19, %v1023_v7  ;;  %v1021_v53 = vsel %vm1016_vm8, %v1914_v1, %v1833_v20  ;;  %v1034_v54 = vmul.f32 %v1028_v2, %v1887_v45  ;;  %v1115_v20 = vperm.slane %v1305_v63, 0 }
 0x225   : > { %970 = vmatpush.msra.mxu0 %v951_v14  ;;  %990 = vmatpush.msra.mxu1 %v952_v17  ;;  %v1035_v0 = vmul.f32 %v1029_v19, %v1891_v46  ;;  %v1032_v30 = vmul.f32 %v1028_v2, %v1017_v60  ;;  %v1033_v10 = vmul.f32 %v1029_v19, %v1021_v53  ;;  %v1116_v46 = vperm.slane %v1305_v63, 1 }
 0x226   : > { %750 = vmatpush.msrb.mxu2 %v728_v41  ;;  %770 = vmatpush.msrb.mxu3 %v729_v55 }
 0x227   : > { %v1015_v35 = vpop.permute.xlu1 %1014  ;;  %971 = vmatpush.msra.mxu0 %v949_v25  ;;  %991 = vmatpush.msra.mxu1 %v950_v24 }
 0x228   : > { %751 = vmatpush.msrb.mxu2 %v726_v27  ;;  %771 = vmatpush.msrb.mxu3 %v727_v32  ;;  %v1007_v44 = vpop.permute.xlu0 %1006 }
 0x229   : > { %992 = vmatpush.msra.mxu1 %v948_v40  ;;  %972 = vmatpush.msra.mxu0 %v947_v36  ;;  %v1020_v12 = vsel %vm1016_vm8, %v1007_v44, %v1015_v35  ;;  %v1024_v57 = vsel %vm1016_vm8, %v1015_v35, %v1007_v44  ;;  %v1128_v36 = vld [vmem:[#allocation2 + $0x40] sm:$0xff] }
 0x22a   : > { %752 = vmatpush.msrb.mxu2 %v724_v26  ;;  %772 = vmatpush.msrb.mxu3 %v725_v29  ;;  %v1038_v34 = vmul.f32 %v1028_v2, %v1020_v12  ;;  %v1039_v61 = vmul.f32 %v1029_v19, %v1024_v57  ;;  %v1094_v6 = vpop.permute.xlu2 %1093 }
 0x22b   : > { %973 = vmatpush.msra.mxu0 %v945_v42  ;;  %993 = vmatpush.msra.mxu1 %v946_v31 }
 0x22c   : > { %883 = vmatpush.msra.mxu2 %v864_v9  ;;  %903 = vmatpush.msra.mxu3 %v865_v3 }
 0x22d   : > { %1292 = vmatmul.msk.f32.vlgmr.msrb.gmra.mxu2 %vm518_vm9, %v733_v4  ;;  %1293 = vmatmul.msk.f32.vlgmr.msrb.gmra.mxu3 %vm518_vm9, %v733_v4 }
 0x22e   : > { %884 = vmatpush.msra.mxu2 %v862_v48  ;;  %904 = vmatpush.msra.mxu3 %v863_v52 }
 0x22f   : > { %v1092_v18 = vpop.permute.xlu1 %1091  ;;  %1300 = vmatmul.msk.f32.vlgmr.msra.gmra.mxu0 %vm518_vm9, %v954_v51  ;;  %1301 = vmatmul.msk.f32.vlgmr.msra.gmra.mxu1 %vm518_vm9, %v954_v51 }
 0x230   : > { %885 = vmatpush.msra.mxu2 %v860_v49  ;;  %905 = vmatpush.msra.mxu3 %v861_v11  ;;  %v1090_v15 = vpop.permute.xlu0 %1089  ;;  %v1106_v13 = vsel %vm1103_vm10, %v1092_v18, %v1100_v47  ;;  %v1110_v14 = vsel %vm1103_vm10, %v1100_v47, %v1092_v18 }
 0x231   : > { %v1123_v32 = vmul.f32 %v1115_v20, %v1106_v13  ;;  %v1124_v25 = vmul.f32 %v1116_v46, %v1110_v14 }
 0x232   : > { %886 = vmatpush.msra.mxu2 %v858_v62  ;;  %906 = vmatpush.msra.mxu3 %v859_v37  ;;  %v1088_v58 = vpop.permute.xlu2 %1087 }
 0x234   : > { %1057 = vmatpush.msrb.mxu2 %v1038_v34  ;;  %1077 = vmatpush.msrb.mxu3 %v1039_v61 }
 0x235   : > { %1297 = vmatmul.msk.f32.vlgmr.msra.gmra.mxu2 %vm518_vm9, %v867_v16  ;;  %1298 = vmatmul.msk.f32.vlgmr.msra.gmra.mxu3 %vm518_vm9, %v867_v16 }
 0x236   : > { %1058 = vmatpush.msrb.mxu2 %v1036_v33  ;;  %1078 = vmatpush.msrb.mxu3 %v1037_v5 }
 0x237   : > { %v1098_v1 = vpop.permute.xlu1 %1097 }
 0x238   : > { %1059 = vmatpush.msrb.mxu2 %v1034_v54  ;;  %1079 = vmatpush.msrb.mxu3 %v1035_v0  ;;  %v1102_v45 = vpop.permute.xlu0 %1101  ;;  %v1105_v23 = vsel %vm1103_vm10, %v1090_v15, %v1098_v1  ;;  %v1109_v27 = vsel %vm1103_vm10, %v1098_v1, %v1090_v15 }
 0x239   : > { %v1107_v59 = vsel %vm1103_vm10, %v1094_v6, %v1102_v45  ;;  %v1111_v17 = vsel %vm1103_vm10, %v1102_v45, %v1094_v6  ;;  %v1121_v24 = vmul.f32 %v1115_v20, %v1105_v23  ;;  %v1122_v50 = vmul.f32 %v1116_v46, %v1109_v27 }
 0x23a   : > { %1060 = vmatpush.msrb.mxu2 %v1032_v30  ;;  %1080 = vmatpush.msrb.mxu3 %v1033_v10  ;;  %v1125_v41 = vmul.f32 %v1115_v20, %v1107_v59  ;;  %v1126_v55 = vmul.f32 %v1116_v46, %v1111_v17 }
 0x23c   : > { %1144 = vmatpush.msrb.mxu0 %v1125_v41  ;;  %1164 = vmatpush.msrb.mxu1 %v1126_v55 }
 0x23d   : > { %1303 = vmatmul.msk.f32.vlgmr.msrb.gmra.mxu2 %vm518_vm9, %v1041_v21  ;;  %1304 = vmatmul.msk.f32.vlgmr.msrb.gmra.mxu3 %vm518_vm9, %v1041_v21 }
 0x23e   : > { %1145 = vmatpush.msrb.mxu0 %v1123_v32  ;;  %1165 = vmatpush.msrb.mxu1 %v1124_v25 }
 0x240   : > { %v1096_v26 = vpop.permute.xlu0 %1095  ;;  %1166 = vmatpush.msrb.mxu1 %v1122_v50  ;;  %1146 = vmatpush.msrb.mxu0 %v1121_v24 }
 0x241   : > { %v1104_v29 = vsel %vm1103_vm10, %v1088_v58, %v1096_v26  ;;  %v1108_v22 = vsel %vm1103_vm10, %v1096_v26, %v1088_v58 }
 0x242   : > { %v1119_v28 = vmul.f32 %v1115_v20, %v1104_v29  ;;  %v1120_v35 = vmul.f32 %v1116_v46, %v1108_v22 }
 0x244   : > { %1147 = vmatpush.msrb.mxu0 %v1119_v28  ;;  %1167 = vmatpush.msrb.mxu1 %v1120_v35 }
 0x245   : > { %1306 = vmatmul.msk.f32.vlgmr.msrb.gmra.mxu0 %vm518_vm9, %v1128_v36  ;;  %1307 = vmatmul.msk.f32.vlgmr.msrb.gmra.mxu1 %vm518_vm9, %v1128_v36 }
 0x268   : > { %v801_v42 = vpop.f32.mrf.mxu0  ;;  %v821_v56 = vpop.f32.mrf.mxu1 }
 0x296   : > { %v539_v40 = vpop.f32.mrf.mxu2  ;;  %v559_v43 = vpop.f32.mrf.mxu3 }
 0x29e   : > { %v582_v44 = vpop.f32.mrf.mxu2  ;;  %v602_v8 = vpop.f32.mrf.mxu3 }
 0x29f   : > { %v583_v39 = vadd.f32 %v582_v44, %v539_v40  ;;  %v603_v48 = vadd.f32 %v602_v8, %v559_v43 }
 0x2a6   : > { %v667_v9 = vpop.f32.mrf.mxu2  ;;  %v687_v3 = vpop.f32.mrf.mxu3 }
 0x2a7   : > { %v690_v52 = vadd.f32 %v667_v9, %v583_v39  ;;  %v691_v47 = vadd.f32 %v687_v3, %v603_v48 }
 0x2ac   : > { %v975_v2 = vpop.f32.mrf.mxu0  ;;  %v995_v19 = vpop.f32.mrf.mxu1 }
 0x2b0   : > { %v754_v31 = vpop.f32.mrf.mxu2  ;;  %v774_v4 = vpop.f32.mrf.mxu3 }
 0x2b1   : > { %v777_v51 = vadd.f32 %v754_v31, %v690_v52  ;;  %v778_v49 = vadd.f32 %v774_v4, %v691_v47 }
 0x2b3   : > { %v824_v57 = vadd.f32 %v801_v42, %v777_v51  ;;  %v825_v62 = vadd.f32 %v821_v56, %v778_v49 }
 0x2b8   : > { %v888_v11 = vpop.f32.mrf.mxu2  ;;  %v908_v12 = vpop.f32.mrf.mxu3 }
 0x2b9   : > { %v911_v18 = vadd.f32 %v888_v11, %v824_v57  ;;  %v912_v37 = vadd.f32 %v908_v12, %v825_v62 }
 0x2bb   : > { %v998_v38 = vadd.f32 %v975_v2, %v911_v18  ;;  %v999_v7 = vadd.f32 %v995_v19, %v912_v37 }
 0x2c0   : > { %v1062_v15 = vpop.f32.mrf.mxu2  ;;  %v1082_v34 = vpop.f32.mrf.mxu3 }
 0x2c1   : > { %v1085_v61 = vadd.f32 %v1062_v15, %v998_v38  ;;  %v1086_v33 = vadd.f32 %v1082_v34, %v999_v7 }
 0x2c2   : > { %v1149_v5 = vpop.f32.mrf.mxu0  ;;  %v1169_v16 = vpop.f32.mrf.mxu1 }
 0x2c3   : > { %v1172_v60 = vadd.f32 %v1149_v5, %v1085_v61  ;;  %v1173_v53 = vadd.f32 %v1169_v16, %v1086_v33 }
 0x2c5   : > { %1174 = vst [vmem:[%s288_s19] sm:$0xff] %v1172_v60 }
 0x2c6   : > { %1175 = vst [vmem:[%s288_s19 + $0x8] sm:$0xff] %v1173_v53 }
 0x2c7   : > { %1437 = shalt.err (!%p1434_p8)
}
 0x2c8   : > { %1319 = dma.vmem_to_hbm [thread:$0]  (%p1569_p5), %s1191_s20, 256, %s1193_s21, %s1177_s28  }
 0x2c9 PF: > { %p1331_p9 = scmp.ge.s32.totalorder %s1476_s27, 2  ;;  %s1204_s13 = sand.u32 1, %s1464_s24  }
 0x2ca   : > { %s1205_s16 = scalar_lea.sflag [#allocation4], %s1204_s13 }
 0x2cb   : > { %p1326_p10 = pnand %p1331_p9, %p1573_p6 }
 0x2cd   : > { %p1327_p11 = pneg %p1326_p10 }
 0x2cf   : > { %1459 = dma.done.wait (%p1327_p11), %s1205_s16, 256  }
 0x2d0   : > { %1461 = vsyncadd (%p1327_p11), %s1205_s16, 4294967040  ;;  %p18_p12 = scmp.ge.s32.totalorder %s1556_s30, 4   ;;  %s2128_s24 = smov %s1468_s25 }
 0x2d1   : > { %s2129_s25 = smov %s1472_s26  ;;  %s2130_s26 = smov %s1567_s10 }
 0x2d2   : > { %s2131_s27 = smov %s1556_s30  ;;  %20 = sbr.rel (!%p18_p12) target bundleno = 4 (0x4), region = 103 }
 0x2d7   :  { %1211 = vsyncpa [#allocation3], 1 }
 0x2d8   :  { %1213 = vsyncpa [#allocation3 + $0x1], 1 }
 0x2d9   :  { %1214 = vsyncpa [#allocation4], 1 }
 0x2da   :  { %1216 = vsyncpa [#allocation4 + $0x1], 1 }

</bundles_post_ra>
